<compile_context>
chip_gen: v5e
topology: v5e:2x2
jax: 0.10.0
libtpu: 0.0.40
codegen_flags: <defaults>
</compile_context>

<pallas_src>
import functools
import math

import numpy as np
import jax
import jax.numpy as jnp
from jax import lax
from jax.experimental import pallas as pl
from jax.experimental.pallas import tpu as pltpu


def _pick_tile(total: int, preferred: int) -> int:
    """Largest tile <= preferred that evenly divides `total` (sublane friendly)."""
    for t in (preferred, 1024, 512, 256, 128, 64, 32, 16, 8):
        if t <= total and total % t == 0:
            return t
    return total


# ---------------------------------------------------------------------------
# Linear projection kernel:  y = x @ W + b     (W already transposed: (K, N))
# ---------------------------------------------------------------------------
def _linear_kernel(x_ref, w_ref, b_ref, o_ref):
    acc = jnp.dot(x_ref[...], w_ref[...], preferred_element_type=jnp.float32)
    o_ref[...] = (acc + b_ref[...]).astype(o_ref.dtype)


def _linear(x, w, b, out_dtype, *, tm_pref=256):
    M, K = x.shape
    _, N = w.shape
    tm = _pick_tile(M, tm_pref)

    vmem_est = (2 * tm * K * x.dtype.itemsize            # x tiles (double buffered)
                + K * N * w.dtype.itemsize               # resident weight
                + N * 4                                  # bias (f32)
                + 2 * tm * N * np.dtype(out_dtype).itemsize
                + (4 << 20))                             # headroom

    return pl.pallas_call(
        _linear_kernel,
        out_shape=jax.ShapeDtypeStruct((M, N), out_dtype),
        grid=(M // tm,),
        in_specs=[
            pl.BlockSpec((tm, K), lambda i: (i, 0)),
            # constant index_map: weight / bias are fetched once and stay resident
            pl.BlockSpec((K, N), lambda i: (0, 0)),
            pl.BlockSpec((1, N), lambda i: (0, 0)),
        ],
        out_specs=pl.BlockSpec((tm, N), lambda i: (i, 0)),
        compiler_params=pltpu.CompilerParams(
            dimension_semantics=("parallel",),
            vmem_limit_bytes=max(32 << 20, int(vmem_est)),
        ),
    )(x, w, b)


# ---------------------------------------------------------------------------
# Flash-style causal attention over (B*H, T, D):
#   grid = (B*H, query tiles, kv tiles), online softmax, masked-tile skipping.
#   The 1/sqrt(D) scale is already folded into q (via the QKV weights).
# ---------------------------------------------------------------------------
def _flash_attn_kernel(q_ref, k_ref, v_ref, o_ref, m_sc, l_sc, acc_sc,
                       *, tq, tk, compute_dtype, approx_recip):
    qi = pl.program_id(1)
    ki = pl.program_id(2)

    @pl.when(ki == 0)
    def _init():
        m_sc[...] = jnp.full(m_sc.shape, -jnp.inf, dtype=m_sc.dtype)
        l_sc[...] = jnp.zeros(l_sc.shape, dtype=l_sc.dtype)
        acc_sc[...] = jnp.zeros(acc_sc.shape, dtype=acc_sc.dtype)

    # Skip KV tiles that lie entirely above the causal diagonal.
    @pl.when(ki * tk <= qi * tq + (tq - 1))
    def _compute():
        q = q_ref[...]                                     # (tq, D), pre-scaled
        k = k_ref[...]                                     # (tk, D)
        # q @ k^T: contract last dims directly (no materialized transpose).
        s = lax.dot_general(q, k, (((1,), (1,)), ((), ())),
                            preferred_element_type=jnp.float32)      # (tq, tk)

        row = qi * tq + lax.broadcasted_iota(jnp.int32, (tq, tk), 0)
        col = ki * tk + lax.broadcasted_iota(jnp.int32, (tq, tk), 1)
        s = jnp.where(col <= row, s, -jnp.inf)

        m_prev = m_sc[...]
        m_new = jnp.maximum(m_prev, jnp.max(s, axis=-1, keepdims=True))
        alpha = jnp.exp(m_prev - m_new)                    # f32 (EUP)
        p = jnp.exp(s - m_new)                             # (tq, tk) f32
        l_sc[...] = alpha * l_sc[...] + jnp.sum(p, axis=-1, keepdims=True)
        acc_sc[...] = alpha * acc_sc[...] + jnp.dot(
            p.astype(compute_dtype), v_ref[...],
            preferred_element_type=jnp.float32)
        m_sc[...] = m_new

    @pl.when(ki == pl.num_programs(2) - 1)
    def _finalize():
        inv_l = pl.reciprocal(l_sc[...], approx=approx_recip)
        o_ref[...] = (acc_sc[...] * inv_l).astype(o_ref.dtype)


def _flash_attention(q, k, v, *, tq_pref=256, tk_pref=256):
    BH, T, D = q.shape
    tq = _pick_tile(T, tq_pref)
    tk = _pick_tile(T, tk_pref)
    nq, nk = T // tq, T // tk

    itm = q.dtype.itemsize
    vmem_est = (2 * (2 * tq * D + 2 * tk * D) * itm       # q/o + k/v tiles, dbl buffered
                + (2 * tq * 128 + tq * max(D, 128)) * 4   # f32 scratch (lane padded)
                + 6 * tq * tk * 4                         # score / mask temporaries
                + (4 << 20))

    kernel = functools.partial(
        _flash_attn_kernel, tq=tq, tk=tk, compute_dtype=q.dtype,
        approx_recip=bool(q.dtype != jnp.float32))

    return pl.pallas_call(
        kernel,
        out_shape=jax.ShapeDtypeStruct((BH, T, D), q.dtype),
        grid=(BH, nq, nk),
        in_specs=[
            pl.BlockSpec((None, tq, D), lambda b, qi, ki: (b, qi, 0)),   # q
            pl.BlockSpec((None, tk, D), lambda b, qi, ki: (b, ki, 0)),   # k
            pl.BlockSpec((None, tk, D), lambda b, qi, ki: (b, ki, 0)),   # v
        ],
        out_specs=pl.BlockSpec((None, tq, D), lambda b, qi, ki: (b, qi, 0)),
        scratch_shapes=[
            pltpu.VMEM((tq, 1), jnp.float32),   # running row max m
            pltpu.VMEM((tq, 1), jnp.float32),   # running row sum l
            pltpu.VMEM((tq, D), jnp.float32),   # output accumulator
        ],
        compiler_params=pltpu.CompilerParams(
            dimension_semantics=("parallel", "parallel", "arbitrary"),
            vmem_limit_bytes=max(32 << 20, int(vmem_est)),
        ),
    )(q, k, v)


# ---------------------------------------------------------------------------
# Full module forward
# ---------------------------------------------------------------------------
def causal_self_attention(x, w_attn, b_attn, w_proj, b_proj, n_head,
                          *, compute_dtype=jnp.bfloat16):
    """Forward pass of CausalSelfAttention.

    x: (B, T, C); w_attn: (3C, C); b_attn: (3C,); w_proj: (C, C); b_proj: (C,).
    `compute_dtype` is the MXU operand dtype (bf16 by default); softmax and
    all accumulation stay in float32.  Output dtype == x.dtype.
    """
    B, T, C = x.shape
    H = n_head
    D = C // H
    out_dtype = x.dtype
    cd = compute_dtype

    # Weight prep (done once, outside the kernels): pre-transpose to
    # contraction-major and fold 1/sqrt(D) into the Q projection.
    scale = 1.0 / math.sqrt(D)
    w_attn_t = jnp.asarray(w_attn).T                      # (C, 3C)
    w_attn_t = w_attn_t.at[:, :C].multiply(scale)
    b_attn_s = jnp.asarray(b_attn).astype(jnp.float32).at[:C].multiply(scale)
    w_proj_t = jnp.asarray(w_proj).T                      # (C, C)

    # QKV projection.
    x2 = x.reshape(B * T, C).astype(cd)
    qkv = _linear(x2, w_attn_t.astype(cd), b_attn_s.reshape(1, 3 * C),
                  out_dtype=cd)                           # (B*T, 3C)

    # Split heads: (B*T, 3C) -> q/k/v each (B*H, T, D).  XLA-level layout
    # plumbing; keeps the attention kernel free of lane-misaligned slicing.
    qkv = qkv.reshape(B, T, 3, H, D)
    q = qkv[:, :, 0].transpose(0, 2, 1, 3).reshape(B * H, T, D)
    k = qkv[:, :, 1].transpose(0, 2, 1, 3).reshape(B * H, T, D)
    v = qkv[:, :, 2].transpose(0, 2, 1, 3).reshape(B * H, T, D)

    # Causal attention.
    y = _flash_attention(q, k, v)                         # (B*H, T, D)

    # Merge heads back: (B*H, T, D) -> (B*T, C)  == transpose(1,2).view(B,T,C)
    y2 = y.reshape(B, H, T, D).transpose(0, 2, 1, 3).reshape(B * T, C)

    # Output projection.
    out = _linear(y2, w_proj_t.astype(cd),
                  jnp.asarray(b_proj).astype(jnp.float32).reshape(1, C),
                  out_dtype=out_dtype)
    return out.reshape(B, T, C)


def _reference(x, w_attn, b_attn, w_proj, b_proj, n_head):
    """Plain-JAX reference mirroring the PyTorch forward exactly (f32)."""
    B, T, C = x.shape
    D = C // n_head
    qkv = jnp.einsum('btc,oc->bto', x, w_attn) + b_attn
    q, k, v = jnp.split(qkv, 3, axis=2)
    q = q.reshape(B, T, n_head, D).transpose(0, 2, 1, 3)
    k = k.reshape(B, T, n_head, D).transpose(0, 2, 1, 3)
    v = v.reshape(B, T, n_head, D).transpose(0, 2, 1, 3)
    s = jnp.einsum('bhtd,bhsd->bhts', q, k) / math.sqrt(D)
    mask = jnp.tril(jnp.ones((T, T), dtype=bool))
    s = jnp.where(mask[None, None], s, -jnp.inf)
    p = jax.nn.softmax(s, axis=-1)
    y = jnp.einsum('bhts,bhsd->bhtd', p, v)
    y = y.transpose(0, 2, 1, 3).reshape(B, T, C)
    return jnp.einsum('btc,oc->bto', y, w_proj) + b_proj


if __name__ == "__main__":
    # small config consistent with the module: n_embed=32, n_head=4, seq=8, batch=2
    B, T, C, H = 2, 8, 32, 4

    key = jax.random.PRNGKey(0)
    kx, kw1, kb1, kw2, kb2 = jax.random.split(key, 5)

    x = jax.random.normal(kx, (B, T, C), dtype=jnp.float32)
    w_attn = jax.random.normal(kw1, (3 * C, C), dtype=jnp.float32) * 0.02
    b_attn = jax.random.normal(kb1, (3 * C,), dtype=jnp.float32) * 0.02
    w_proj = jax.random.normal(kw2, (C, C), dtype=jnp.float32) * 0.02
    b_proj = jax.random.normal(kb2, (C,), dtype=jnp.float32) * 0.02

    ref = _reference(x, w_attn, b_attn, w_proj, b_proj, H)

    # Exact-precision path (f32 operands end to end).
    out_f32 = causal_self_attention(x, w_attn, b_attn, w_proj, b_proj, H,
                                    compute_dtype=jnp.float32)
    out_f32 = jax.block_until_ready(out_f32)
    assert out_f32.shape == (B, T, C)
    assert jnp.allclose(out_f32, ref, atol=2e-4, rtol=2e-4), "f32 path mismatch"

    # Default bf16 MXU path: same semantics, reduced matmul operand precision.
    out_bf16 = causal_self_attention(x, w_attn, b_attn, w_proj, b_proj, H)
    out_bf16 = jax.block_until_ready(out_bf16)
    assert out_bf16.shape == (B, T, C)
    assert jnp.allclose(out_bf16, ref, atol=3e-2, rtol=3e-2), "bf16 path mismatch"

    print("KERNEL_OK")
</pallas_src>

<mosaic_0001>
module attributes {stable_mosaic.version = 11 : i64} {
  func.func @_linear_kernel(%arg0: i32, %arg1: memref<16x32xf32, #tpu.memory_space<vmem>>, %arg2: memref<32x96xf32, #tpu.memory_space<vmem>>, %arg3: memref<1x96xf32, #tpu.memory_space<vmem>>, %arg4: memref<16x96xf32, #tpu.memory_space<vmem>>) attributes {dimension_semantics = [#tpu.dimension_semantics<parallel>], iteration_bounds = array<i64: 1>, scalar_prefetch = 0 : i64, scratch_operands = 0 : i64, tpu.core_type = #tpu.core_type<tc>, window_params = [{transform_indices = @transform_0, window_bounds = array<i64: 16, 32>}, {pipeline_mode = #tpu.pipeline_mode<synchronous>, transform_indices = @transform_1, window_bounds = array<i64: 32, 96>}, {pipeline_mode = #tpu.pipeline_mode<synchronous>, transform_indices = @transform_2, window_bounds = array<i64: 1, 96>}, {transform_indices = @transform_3, window_bounds = array<i64: 16, 96>}]} {
    %c0 = arith.constant 0 : index
    %c0_0 = arith.constant 0 : index
    %0 = vector.load %arg1[%c0, %c0_0] : memref<16x32xf32, #tpu.memory_space<vmem>>, vector<16x32xf32>
    %c0_1 = arith.constant 0 : index
    %c0_2 = arith.constant 0 : index
    %1 = vector.load %arg2[%c0_1, %c0_2] : memref<32x96xf32, #tpu.memory_space<vmem>>, vector<32x96xf32>
    %cst = arith.constant dense<0.000000e+00> : vector<16x96xf32>
    %2 = tpu.matmul %0, %1, %cst {dimension_numbers = #tpu.dot_dimension_numbers<[1], [0], [0], [1], [0, 0, 1, 1], [], []>} : vector<16x32xf32>, vector<32x96xf32>, vector<16x96xf32> -> vector<16x96xf32>
    %c0_3 = arith.constant 0 : index
    %c0_4 = arith.constant 0 : index
    %3 = vector.load %arg3[%c0_3, %c0_4] : memref<1x96xf32, #tpu.memory_space<vmem>>, vector<1x96xf32>
    %4 = vector.broadcast %3 : vector<1x96xf32> to vector<16x96xf32>
    %5 = arith.addf %2, %4 : vector<16x96xf32>
    %c0_5 = arith.constant 0 : index
    %c0_6 = arith.constant 0 : index
    %6 = vector.load %arg4[%c0_5, %c0_6] : memref<16x96xf32, #tpu.memory_space<vmem>>, vector<16x96xf32>
    tpu.vector_store %arg4[%c0_5, %c0_6], %5 {strides = array<i32>} : memref<16x96xf32, #tpu.memory_space<vmem>>, vector<16x96xf32>,
    return
  }
  func.func @transform_0(%arg0: i32) -> (i32, i32) {
    %c0_i32 = arith.constant 0 : i32
    %c0_i32_0 = arith.constant 0 : i32
    return %arg0, %c0_i32 : i32, i32
  }
  func.func @transform_1(%arg0: i32) -> (i32, i32) {
    %c0_i32 = arith.constant 0 : i32
    %c0_i32_0 = arith.constant 0 : i32
    %c0_i32_1 = arith.constant 0 : i32
    return %c0_i32, %c0_i32_0 : i32, i32
  }
  func.func @transform_2(%arg0: i32) -> (i32, i32) {
    %c0_i32 = arith.constant 0 : i32
    %c0_i32_0 = arith.constant 0 : i32
    %c0_i32_1 = arith.constant 0 : i32
    return %c0_i32, %c0_i32_0 : i32, i32
  }
  func.func @transform_3(%arg0: i32) -> (i32, i32) {
    %c0_i32 = arith.constant 0 : i32
    %c0_i32_0 = arith.constant 0 : i32
    return %arg0, %c0_i32 : i32, i32
  }
}

</mosaic_0001>

<bundles_post_ra>
// kernel: tpu_custom_call.1
= control target key start
LH: loop header
LB: loop body
LE: loop exit
PB: predicated region body
PF: predicated region fallthrough
CT: control target
= control target key end

     0   :  { %8 = vsyncpa [#allocation3], 0  ;;  %s246_s0 = inlined_call_operand.hbm [shape: f32[16,32], index: 0, kind: input, shape index: {}]   ;;  %s247_s1 = inlined_call_operand.hbm [shape: f32[32,96], index: 1, kind: input, shape index: {}]   ;;  %s248_s2 = inlined_call_operand.vmem [shape: f32[1,96], index: 2, kind: input, shape index: {}]   ;;  %s249_s3 = inlined_call_operand.hbm [shape: f32[16,96], index: 3, kind: output, shape index: {}]  }
   0x1   :  { %9 = vsyncpa [#allocation6], 0 }
   0x2   :  { %10 = vsyncpa [#allocation4], 0  ;;  %s15_s14 = sshll.u32 %s246_s0, 4  ;;  %s200_s15 = smov [#allocation2]   ;;  %s16_s14 = int_to_ptr.hbm [resolvable:$true] %s15_s14 }
   0x3   :  { %s17_s16 = sshll.u32 %s200_s15, 4  ;;  %s28_s19 = sshll.u32 %s247_s1, 4  ;;  %s18_s16 = int_to_ptr.vmem [resolvable:$true] %s17_s16  ;;  %s29_s19 = int_to_ptr.hbm [resolvable:$true] %s28_s19 }
   0x4   :  { %s201_s20 = smov 128   ;;  %s202_s21 = smov 8  }
   0x5   :  { %23 = dma.hbm_to_vmem [thread:$0]  %s16_s14, 256, %s18_s16, [#allocation3], %s201_s20, %s201_s20, %s202_s21  }
   0x6   :  { %s203_s22 = smov [#allocation5]  }
   0x7   :  { %s30_s23 = sshll.u32 %s203_s22, 4  ;;  %s31_s23 = int_to_ptr.vmem [resolvable:$true] %s30_s23 }
   0x8   :  { %36 = dma.hbm_to_vmem [thread:$0]  %s29_s19, 512, %s31_s23, [#allocation6], %s201_s20, %s201_s20, %s202_s21  }
   0x9   :  { %194 = dma.done.wait [#allocation3], 256  }
   0xa   :  { %195 = vsyncadd [#allocation3], 4294967040 }
   0xb   :  { %196 = dma.done.wait [#allocation6], 512  }
   0xc   :  { %197 = vsyncadd [#allocation6], 4294966784  ;;  %v52_v0 = vld [vmem:[#allocation5 + $0x18] sm:$0xff]  ;;  %v51_v1 = vld [vmem:[#allocation5 + $0x10] sm:$0xff]  ;;  %vm57_vm0 = vcmask 261120   ;;  %s204_s24 = smov [#allocation7]  }
   0xd   :  { %76 = vmatpush.msra.mxu0 %v52_v0  ;;  %112 = vmatpush.msra.mxu1 %v52_v0  ;;  %v50_v2 = vld [vmem:[#allocation5 + $0x8] sm:$0xff]  ;;  %v49_v3 = vld [vmem:[#allocation5] sm:$0xff]  ;;  %v47_v4 = vld [vmem:[#allocation2] sm:$0xff]  ;;  %s94_s25 = sshll.u32 %s204_s24, 4  ;;  %s96_s28 = sshll.u32 %s249_s3, 4  ;;  %vm87_vm1 = vcmask 785408   ;;  %s95_s25 = int_to_ptr.vmem [resolvable:$true] %s94_s25  ;;  %s97_s28 = int_to_ptr.hbm [resolvable:$true] %s96_s28 }
   0xe   :  { %v48_v5 = vld [vmem:[#allocation2 + $0x8] sm:$0xff]  ;;  %v121_v6 = vld [vmem:[%s248_s2] ss:$0 sm:$0xff] }
   0xf   :  { %77 = vmatpush.msra.mxu0 %v51_v1  ;;  %113 = vmatpush.msra.mxu1 %v51_v1 }
  0x11   :  { %78 = vmatpush.msra.mxu0 %v50_v2  ;;  %114 = vmatpush.msra.mxu1 %v50_v2 }
  0x13   :  { %79 = vmatpush.msra.mxu0 %v49_v3  ;;  %115 = vmatpush.msra.mxu1 %v49_v3 }
  0x14   :  { %110 = vmatmul.msk.f32.vlgmr.msra.gmra.mxu0 %vm57_vm0, %v47_v4  ;;  %111 = vmatmul.msk.f32.vlgmr.msra.gmra.mxu1 %vm57_vm0, %v48_v5 }
  0x91   :  { %v81_v7 = vpop.f32.mrf.mxu0  ;;  %v84_v8 = vpop.f32.mrf.mxu1 }
  0x92   :  { %v82_v9 = vadd.f32 %v121_v6, %v81_v7  ;;  %v85_v10 = vadd.f32 %v121_v6, %v84_v8 }
  0x94   :  { %88 = vst.msk [vmem:[#allocation7] sm:$0xff] %vm87_vm1, %v82_v9 }
  0x95   :  { %89 = vst.msk [vmem:[#allocation7 + $0x8] sm:$0xff] %vm87_vm1, %v85_v10 }
  0x96   :  { %102 = dma.vmem_to_hbm [thread:$0]  %s95_s25, 256, %s97_s28, [#allocation4], %s201_s20, %s201_s20, %s202_s21  }
  0x97   :  { %198 = dma.done.wait [#allocation4], 256  }
  0x98   :  { %199 = vsyncadd [#allocation4], 4294967040 }
  0x99   :  { %107 = vsyncpa [#allocation3], 1 }
  0x9a   :  { %108 = vsyncpa [#allocation6], 1 }
  0x9b   :  { %109 = vsyncpa [#allocation4], 1 }

</bundles_post_ra>
